<compile_context>
chip_gen: v5e
topology: v5e:2x2
jax: 0.10.0
libtpu: 0.0.40
codegen_flags: <defaults>
</compile_context>

<pallas_src>
import functools

import jax
import jax.numpy as jnp
from jax.experimental import pallas as pl
from jax.experimental.pallas import tpu as pltpu


def _round_up(x, m):
    return ((x + m - 1) // m) * m


_TILE_CAP_MN = 512  # multiple of 256: fills v6e/v7x 256x256 MXU passes
_TILE_CAP_K = 512


def _mm_kernel(x1_ref, x2_ref, o_ref, *scratch,
               batched: bool, use_acc: bool,
               k_total: int, k_tile: int, mask_k: bool):
    """Computes one (batch-pack, M-tile, N-tile) output block; K streamed on grid axis 3."""
    acc_ref = scratch[0] if use_acc else o_ref
    k = pl.program_id(3)

    @pl.when(k == 0)
    def _():
        acc_ref[...] = jnp.zeros_like(acc_ref)

    x1 = x1_ref[...]
    x2 = x2_ref[...]
    if mask_k:
        # Ragged K: zero the out-of-range K slices of BOTH operands so stale VMEM
        # contents (possibly Inf/NaN) in the partially-filled edge block cannot
        # contaminate the accumulation (0 * garbage would otherwise be NaN-prone).
        base = k * k_tile
        c1 = jax.lax.broadcasted_iota(jnp.int32, x1.shape, x1.ndim - 1) + base
        c2 = jax.lax.broadcasted_iota(jnp.int32, x2.shape, x2.ndim - 2) + base
        x1 = jnp.where(c1 < k_total, x1, jnp.zeros_like(x1))
        x2 = jnp.where(c2 < k_total, x2, jnp.zeros_like(x2))

    if batched:
        prod = jnp.einsum("bmk,bkn->bmn", x1, x2,
                          preferred_element_type=jnp.float32)
    else:
        prod = jnp.dot(x1, x2, preferred_element_type=jnp.float32)

    acc_ref[...] += prod  # o_ref itself when output is f32 (resident across k)

    if use_acc:
        @pl.when(k == pl.num_programs(3) - 1)
        def _():
            o_ref[...] = acc_ref[...].astype(o_ref.dtype)


def _choose_tiles(B, M, N, K, compute_dtype):
    sub = 16 if jnp.dtype(compute_dtype).itemsize == 2 else 8
    tm = M if M <= _TILE_CAP_MN else _TILE_CAP_MN
    tn = N if N <= _TILE_CAP_MN else _TILE_CAP_MN
    tk = K if K <= _TILE_CAP_K else _TILE_CAP_K
    # Keep >= 2 "parallel" grid steps so both v7x TensorCores get work: split the M
    # axis rather than shrinking the lane-dense N tile.
    if B * pl.cdiv(M, tm) * pl.cdiv(N, tn) < 2 and M >= 2 * sub:
        tm = _round_up(pl.cdiv(M, 2), sub)
    return tm, tn, tk


def _pick_bb(B, M, N, K, itemsize):
    """Pack several tiny per-batch matmuls into one grid step (amortize step overhead)."""
    if B <= 1 or M > 128 or N > 128 or K > 512:
        return 1
    per_batch = itemsize * 2 * (M * K + K * N + M * N) + 4 * M * N
    bb_cap = max(1, min(16, (8 * 1024 * 1024) // max(per_batch, 1)))
    bb_cap = min(bb_cap, max(1, B // 2))  # keep >= 2 parallel steps for megacore
    bb = 1
    for d in range(1, bb_cap + 1):
        if B % d == 0:
            bb = d
    return bb


def pallas_matmul(x1, x2, *, use_bf16_compute=False):
    """torch-style `x1 @ x2` for 2-D or batched 3-D inputs."""
    squeeze_batch = False
    if x1.ndim == 2 and x2.ndim == 2:
        x1, x2 = x1[None], x2[None]
        squeeze_batch = True
    assert x1.ndim == 3 and x2.ndim == 3, "expect 2-D or batched 3-D inputs"

    B, M, K = x1.shape
    B2, K2, N = x2.shape
    assert B == B2 and K == K2, f"shape mismatch: {x1.shape} @ {x2.shape}"

    out_dtype = jnp.result_type(x1.dtype, x2.dtype)
    f32 = jnp.dtype(jnp.float32)
    bf16 = jnp.dtype(jnp.bfloat16)

    if jnp.dtype(out_dtype) == bf16:
        compute_dtype = bf16  # MXU-native, f32 accumulation
    elif jnp.issubdtype(out_dtype, jnp.floating):
        compute_dtype = f32   # f32; fp16/f64 promoted (MXU is bf16/f32 native)
    else:
        # TODO(synk): exact integer matmul semantics (torch int `@`) not implemented;
        # integers are computed in f32 and cast back (precision loss beyond 2^24).
        compute_dtype = f32
    if use_bf16_compute and compute_dtype == f32:
        compute_dtype = bf16  # opt-in: bf16 operands, f32 accumulation

    pallas_out_dtype = jnp.dtype(out_dtype) if jnp.dtype(out_dtype) in (f32, bf16) else f32
    use_acc = pallas_out_dtype != f32  # f32 output: accumulate directly into o_ref

    x1c = x1.astype(compute_dtype) if x1.dtype != compute_dtype else x1
    x2c = x2.astype(compute_dtype) if x2.dtype != compute_dtype else x2

    c_item = jnp.dtype(compute_dtype).itemsize
    o_item = jnp.dtype(pallas_out_dtype).itemsize

    tm, tn, tk = _choose_tiles(B, M, N, K, compute_dtype)
    bb = _pick_bb(B, M, N, K, c_item)
    mask_k = (K % tk) != 0

    grid = (pl.cdiv(B, bb), pl.cdiv(M, tm), pl.cdiv(N, tn), pl.cdiv(K, tk))

    if bb == 1:
        in_specs = [
            pl.BlockSpec((None, tm, tk), lambda b, i, j, k: (b, i, k)),
            pl.BlockSpec((None, tk, tn), lambda b, i, j, k: (b, k, j)),
        ]
        out_spec = pl.BlockSpec((None, tm, tn), lambda b, i, j, k: (b, i, j))
        acc_shape = (tm, tn)
    else:
        in_specs = [
            pl.BlockSpec((bb, tm, tk), lambda b, i, j, k: (b, i, k)),
            pl.BlockSpec((bb, tk, tn), lambda b, i, j, k: (b, k, j)),
        ]
        out_spec = pl.BlockSpec((bb, tm, tn), lambda b, i, j, k: (b, i, j))
        acc_shape = (bb, tm, tn)

    scratch_shapes = [pltpu.VMEM(acc_shape, jnp.float32)] if use_acc else []

    kernel = functools.partial(
        _mm_kernel, batched=(bb > 1), use_acc=use_acc,
        k_total=K, k_tile=tk, mask_k=mask_k)

    # Real traffic for this schedule: x1 re-streamed once per N tile, x2 once per M tile.
    n_m, n_n = pl.cdiv(M, tm), pl.cdiv(N, tn)
    cost = pl.CostEstimate(
        flops=2 * B * M * N * K,
        bytes_accessed=int(c_item * B * (M * K * n_n + K * N * n_m) + o_item * B * M * N),
        transcendentals=0,
    )

    # VMEM: double-buffered inputs + double-buffered output (+ f32 acc if separate),
    # with 2x headroom, capped at 48 MiB so it is safe on v7x's 64 MiB VMEM.
    need = bb * (2 * (tm * tk + tk * tn) * c_item + 2 * tm * tn * o_item
                 + (tm * tn * 4 if use_acc else 0))
    vmem_limit = int(min(48 * 1024 * 1024, max(32 * 1024 * 1024, 2 * need)))

    out = pl.pallas_call(
        kernel,
        out_shape=jax.ShapeDtypeStruct((B, M, N), pallas_out_dtype),
        grid_spec=pltpu.PrefetchScalarGridSpec(
            num_scalar_prefetch=0,
            grid=grid,
            in_specs=in_specs,
            out_specs=out_spec,
            scratch_shapes=scratch_shapes,
        ),
        compiler_params=pltpu.CompilerParams(
            dimension_semantics=("parallel", "parallel", "parallel", "arbitrary"),
            vmem_limit_bytes=vmem_limit,
        ),
        cost_estimate=cost,
    )(x1c, x2c)

    if out.dtype != out_dtype:
        out = out.astype(out_dtype)
    if squeeze_batch:
        out = out[0]
    return out


if __name__ == "__main__":
    key = jax.random.PRNGKey(0)
    k1, k2 = jax.random.split(key)

    # 1) TransGAN attention-sized tiny matmul (q @ k^T style): batch*heads=2, seq=8, dim=32.
    B, M, K, N = 2, 8, 32, 8
    x1 = jax.random.normal(k1, (B, M, K), dtype=jnp.float32)
    x2 = jax.random.normal(k2, (B, K, N), dtype=jnp.float32)
    out = jax.block_until_ready(pallas_matmul(x1, x2))
    ref = jnp.matmul(x1, x2)
    assert out.shape == (B, M, N)
    assert jnp.allclose(out, ref, atol=1e-4, rtol=1e-4), "mismatch (tiny)"

    # 2) Non-tile-multiple dims, single output tile per batch (no padding anywhere).
    a = jax.random.normal(k1, (2, 192, 384), dtype=jnp.float32)
    b = jax.random.normal(k2, (2, 384, 160), dtype=jnp.float32)
    out2 = jax.block_until_ready(pallas_matmul(a, b))
    ref2 = jnp.matmul(a, b)
    assert jnp.allclose(out2, ref2, atol=1e-2, rtol=1e-2), "mismatch (medium)"

    # 3) Ragged K > tile (exercises in-kernel K-tail mask + split-M parallel path), B=1.
    a3 = jax.random.normal(k1, (1, 120, 700), dtype=jnp.float32)
    b3 = jax.random.normal(k2, (1, 700, 200), dtype=jnp.float32)
    out3 = jax.block_until_ready(pallas_matmul(a3, b3))
    ref3 = jnp.matmul(a3, b3)
    assert jnp.allclose(out3, ref3, atol=2e-2, rtol=2e-2), "mismatch (ragged K)"

    # 4) Many tiny batches -> batch-packed einsum path.
    a4 = jax.random.normal(k1, (8, 8, 32), dtype=jnp.float32)
    b4 = jax.random.normal(k2, (8, 32, 8), dtype=jnp.float32)
    out4 = jax.block_until_ready(pallas_matmul(a4, b4))
    ref4 = jnp.matmul(a4, b4)
    assert jnp.allclose(out4, ref4, atol=1e-4, rtol=1e-4), "mismatch (batch-packed)"

    # 5) bf16 inputs -> bf16 MXU compute, f32 accumulator scratch, bf16 output.
    a5 = jax.random.normal(k1, (2, 64, 160), dtype=jnp.bfloat16)
    b5 = jax.random.normal(k2, (2, 160, 96), dtype=jnp.bfloat16)
    out5 = jax.block_until_ready(pallas_matmul(a5, b5))
    ref5 = jnp.matmul(a5, b5)
    assert out5.dtype == jnp.bfloat16
    assert jnp.allclose(out5.astype(jnp.float32), ref5.astype(jnp.float32),
                        atol=0.5, rtol=5e-2), "mismatch (bf16)"

    print("KERNEL_OK")
</pallas_src>

<mosaic_0001>
module attributes {stable_mosaic.version = 11 : i64} {
  func.func @_mm_kernel(%arg0: i32, %arg1: i32, %arg2: i32, %arg3: i32, %arg4: memref<1x8x32xf32, #tpu.memory_space<vmem>>, %arg5: memref<1x32x8xf32, #tpu.memory_space<vmem>>, %arg6: memref<1x8x8xf32, #tpu.memory_space<vmem>>) attributes {dimension_semantics = [#tpu.dimension_semantics<parallel>, #tpu.dimension_semantics<parallel>, #tpu.dimension_semantics<parallel>, #tpu.dimension_semantics<arbitrary>], iteration_bounds = array<i64: 2, 1, 1, 1>, scalar_prefetch = 0 : i64, scratch_operands = 0 : i64, tpu.core_type = #tpu.core_type<tc>, window_params = [{transform_indices = @transform_0, window_bounds = array<i64: 1, 8, 32>}, {transform_indices = @transform_1, window_bounds = array<i64: 1, 32, 8>}, {transform_indices = @transform_2, window_bounds = array<i64: 1, 8, 8>}]} {
    %c0_i32 = arith.constant 0 : i32
    %0 = arith.cmpi eq, %arg3, %c0_i32 : i32
    %1 = arith.extui %0 : i1 to i32
    %c0_i32_0 = arith.constant 0 : i32
    %2 = arith.cmpi ne, %1, %c0_i32_0 : i32
    scf.if %2 {
      %cst_12 = arith.constant 0.000000e+00 : f32
      %14 = vector.broadcast %cst_12 : f32 to vector<8x8xf32>
      %c0_13 = arith.constant 0 : index
      %c0_14 = arith.constant 0 : index
      %c0_15 = arith.constant 0 : index
      %15 = vector.load %arg6[%c0_13, %c0_14, %c0_15] : memref<1x8x8xf32, #tpu.memory_space<vmem>>, vector<1x8x8xf32>
      %16 = vector.shape_cast %15 : vector<1x8x8xf32> to vector<8x8xf32>
      %17 = vector.shape_cast %14 : vector<8x8xf32> to vector<1x8x8xf32>
      tpu.vector_store %arg6[%c0_13, %c0_14, %c0_15], %17 {strides = array<i32>} : memref<1x8x8xf32, #tpu.memory_space<vmem>>, vector<1x8x8xf32>,
    } else {
    }
    %c0 = arith.constant 0 : index
    %c0_1 = arith.constant 0 : index
    %c0_2 = arith.constant 0 : index
    %3 = vector.load %arg4[%c0, %c0_1, %c0_2] : memref<1x8x32xf32, #tpu.memory_space<vmem>>, vector<1x8x32xf32>
    %4 = vector.shape_cast %3 : vector<1x8x32xf32> to vector<8x32xf32>
    %c0_3 = arith.constant 0 : index
    %c0_4 = arith.constant 0 : index
    %c0_5 = arith.constant 0 : index
    %5 = vector.load %arg5[%c0_3, %c0_4, %c0_5] : memref<1x32x8xf32, #tpu.memory_space<vmem>>, vector<1x32x8xf32>
    %6 = vector.shape_cast %5 : vector<1x32x8xf32> to vector<32x8xf32>
    %cst = arith.constant dense<0.000000e+00> : vector<8x8xf32>
    %7 = tpu.matmul %4, %6, %cst {dimension_numbers = #tpu.dot_dimension_numbers<[1], [0], [0], [1], [0, 0, 1, 1], [], []>} : vector<8x32xf32>, vector<32x8xf32>, vector<8x8xf32> -> vector<8x8xf32>
    %c0_6 = arith.constant 0 : index
    %c0_7 = arith.constant 0 : index
    %c0_8 = arith.constant 0 : index
    %8 = vector.load %arg6[%c0_6, %c0_7, %c0_8] : memref<1x8x8xf32, #tpu.memory_space<vmem>>, vector<1x8x8xf32>
    %9 = vector.shape_cast %8 : vector<1x8x8xf32> to vector<8x8xf32>
    %10 = arith.addf %9, %7 : vector<8x8xf32>
    %c0_9 = arith.constant 0 : index
    %c0_10 = arith.constant 0 : index
    %c0_11 = arith.constant 0 : index
    %11 = vector.load %arg6[%c0_9, %c0_10, %c0_11] : memref<1x8x8xf32, #tpu.memory_space<vmem>>, vector<1x8x8xf32>
    %12 = vector.shape_cast %11 : vector<1x8x8xf32> to vector<8x8xf32>
    %13 = vector.shape_cast %10 : vector<8x8xf32> to vector<1x8x8xf32>
    tpu.vector_store %arg6[%c0_9, %c0_10, %c0_11], %13 {strides = array<i32>} : memref<1x8x8xf32, #tpu.memory_space<vmem>>, vector<1x8x8xf32>,
    return
  }
  func.func @transform_0(%arg0: i32, %arg1: i32, %arg2: i32, %arg3: i32) -> (i32, i32, i32) {
    %c0_i32 = arith.constant 0 : i32
    return %arg0, %arg1, %arg3 : i32, i32, i32
  }
  func.func @transform_1(%arg0: i32, %arg1: i32, %arg2: i32, %arg3: i32) -> (i32, i32, i32) {
    %c0_i32 = arith.constant 0 : i32
    return %arg0, %arg3, %arg2 : i32, i32, i32
  }
  func.func @transform_2(%arg0: i32, %arg1: i32, %arg2: i32, %arg3: i32) -> (i32, i32, i32) {
    %c0_i32 = arith.constant 0 : i32
    return %arg0, %arg1, %arg2 : i32, i32, i32
  }
}

</mosaic_0001>

<bundles_post_ra>
// kernel: tpu_custom_call.1
= control target key start
LH: loop header
LB: loop body
LE: loop exit
PB: predicated region body
PF: predicated region fallthrough
CT: control target
= control target key end

     0   :  { %7 = vsyncpa [#allocation3], 0  ;;  %s670_s0 = inlined_call_operand.vmem [shape: f32[2,8,32], index: 0, kind: input, shape index: {}]   ;;  %s671_s1 = inlined_call_operand.vmem [shape: f32[2,32,8], index: 1, kind: input, shape index: {}]   ;;  %s672_s2 = inlined_call_operand.hbm [shape: f32[2,8,8], index: 2, kind: output, shape index: {}]  }
   0x1   :  { %9 = vsyncpa [#allocation3 + $0x1], 0  ;;  %s564_s9 = smov 0   ;;  %s566_s10 = smov 0  }
   0x2   :  { %s568_s11 = smov 0   ;;  %s570_s12 = smov 0  }
   0x3   :  { %s572_s13 = smov 0   ;;  %s574_s14 = smov 0  }
   0x4 LB: > { %s397_s15 = sadd.s32 4294967295, %s546_s14   ;;  %s398_s16 = sadd.s32 4294967294, %s546_s14   ;;  %s546_s14 = sphi %s574_s14, %s15_s14   ;;  %s542_s13 = sphi %s572_s13, %s679_s13   ;;  %s538_s12 = sphi %s570_s12, %s678_s12   ;;  %s534_s11 = sphi %s568_s11, %s677_s11   ;;  %s530_s10 = sphi %s566_s10, %s676_s10   ;;  %s526_s9 = sphi %s564_s9, %s675_s9  }
   0x5   : > { %s41_s17 = sadd.s32 1, %s542_s13  ;;  %s112_s18 = sadd.s32 1, %s534_s11 }
   0x6   : > { %p43_p0 = scmp.ge.s32.totalorder %s41_s17, 2  ;;  %p122_p1 = scmp.ne.s32.totalorder %s534_s11, %s530_s10 }
   0x7   : > { %p123_p2 = scmp.eq.s32.totalorder %s397_s15, 1  ;;  %p128_p3 = scmp.ne.s32.totalorder %s530_s10, %s526_s9 }
   0x8   : > { %s681_s17 = smov (%p43_p0, %s41_s17), 0  ;;  %p129_p5 = scmp.eq.s32.totalorder %s398_s16, 1 }
   0x9   : > { %p604_p4 = por %p123_p2, %p122_p1  ;;  %s105_s20 = ssub.s32 %s542_s13, %s681_s17 }
   0xa   : > { %p401_p6 = scmp.ge.s32.totalorder %s546_s14, 1  ;;  %p110_p7 = scmp.eq.s32.totalorder %s105_s20, 0 }
   0xb   : > { %p611_p8 = por %p129_p5, %p128_p3  ;;  %p176_p9 = scmp.lt.s32.totalorder %s546_s14, 3 }
   0xc   : > { %s617_s22 = scalar_select %p110_p7, %s534_s11, %s112_s18  }
   0xd   : > { %p177_p10 = pnand %p401_p6, %p176_p9 }
   0xe   : > { %p215_p11 = scmp.lt.s32.totalorder (!%p177_p10), %s538_s12, 1  ;;  %s212_s23 = sand.u32 (!%p177_p10), 1, %s530_s10  }
   0xf   : > { %180 = sbr.rel (%p177_p10) target bundleno = 163 (0xa3), region = 28  ;;  %s402_s24 = sshll.u32 (!%p177_p10), %s212_s23, 3 }
  0x10   : > { %s214_s27 = scalar_lea.vmem (!%p177_p10), [#allocation2], %s402_s24  ;;  %s408_s7 = sshll.u32 (!%p177_p10), %s538_s12, 3 }
  0x11   : > { %s290_s16 = scalar_lea.hbm (!%p177_p10), %s672_s2, %s408_s7  ;;  %s292_s18 = sshll.u32 (!%p177_p10), %s214_s27, 4  ;;  %s293_s18 = int_to_ptr.vmem [resolvable:$true] %s292_s18 }
  0x12   : > { %s294_s20 = sshll.u32 (!%p177_p10), %s290_s16, 4  ;;  %s278_s24 = scalar_lea.sflag (!%p177_p10), [#allocation3], %s212_s23  ;;  %s295_s20 = int_to_ptr.hbm [resolvable:$true] %s294_s20 }
  0x13   : > { %s488_s29 = scalar_lea.hbm (!%p177_p10), %s672_s2, 16 }
  0x14   : > { %vm242_vm0 = vcmask 64512   ;;  %s216_s25 = scalar_select %p215_p11, %s538_s12, 1  ;;  %v548_v0 = vmov 0.0   ;;  %vm249_vm1 = vcmask 261120  }
  0x15   : > { %243 = vst.msk [vmem:[%s214_s27] sm:$0xff] %vm242_vm0, %v548_v0 }
  0x16   : > { %s411_s26 = sshll.u32 %s216_s25, 5  ;;  %s403_s3 = sshll.u32 %s216_s25, 3 }
  0x17   : > { %s236_s30 = scalar_lea.vmem %s671_s1, %s411_s26  ;;  %s224_s6 = scalar_lea.vmem %s670_s0, %s403_s3 }
  0x18   : > { %v248_v1 = vld [vmem:[%s236_s30 + $0x18] sm:$0xff]  ;;  %v247_v2 = vld [vmem:[%s236_s30 + $0x10] sm:$0xff]  ;;  %v246_v3 = vld [vmem:[%s236_s30 + $0x8] sm:$0xff]  ;;  %s482_s25 = sshra.s32 %s295_s20, 4  ;;  %s483_s25 = int_to_ptr.hbm [resolvable:$true] %s482_s25 }
  0x19   : > { %265 = vmatpush.msra.mxu0 %v248_v1  ;;  %v245_v4 = vld [vmem:[%s236_s30] sm:$0xff]  ;;  %s484_s26 = scalar_lea.hbm %s483_s25, 8  ;;  %p489_p1 = scmp.lt.s32.totalorder %s483_s25, %s672_s2 }
  0x1a   : > { %v244_v5 = vld [vmem:[%s224_s6] sm:$0xff]  ;;  %p485_p12 = scmp.ne.s32.totalorder %s483_s25, %s484_s26  ;;  %p490_p2 = scmp.lt.s32.totalorder %s488_s29, %s484_s26 }
  0x1b   : > { %266 = vmatpush.msra.mxu0 %v247_v2 }
  0x1c   : > { %v273_v6 = vld [vmem:[%s214_s27] sm:$0xff]  ;;  %p486_p13 = pnand %p485_p12, %p604_p4  ;;  %p491_p3 = por %p490_p2, %p489_p1 }
  0x1d   : > { %267 = vmatpush.msra.mxu0 %v246_v3 }
  0x1e   : > { %p487_p0 = pneg %p486_p13 }
  0x1f   : > { %268 = vmatpush.msra.mxu0 %v245_v4 }
  0x20   : > { %406 = vmatmul.msk.f32.vlgmr.msra.gmra.mxu0 %vm249_vm1, %v244_v5  ;;  %p492_p5 = pnand %p491_p3, %p487_p0 }
  0x9d   : > { %v270_v7 = vpop.f32.mrf.mxu0 }
  0x9e   : > { %v274_v8 = vadd.f32 %v273_v6, %v270_v7 }
  0xa0   : > { %276 = vst.msk [vmem:[%s214_s27] sm:$0xff] %vm242_vm0, %v274_v8 }
  0xa1   : > { %495 = shalt.err (!%p492_p5)
}
  0xa2   : > { %412 = dma.vmem_to_hbm [thread:$0]  (%p604_p4), %s293_s18, 128, %s295_s20, %s278_s24  }
  0xa3 PF: > { %p418_p6 = scmp.ge.s32.totalorder %s546_s14, 2  ;;  %s306_s23 = sand.u32 1, %s526_s9  }
  0xa4   : > { %s307_s27 = scalar_lea.sflag [#allocation3], %s306_s23 }
  0xa5   : > { %p415_p7 = pnand %p418_p6, %p611_p8 }
  0xa7   : > { %p416_p9 = pneg %p415_p7 }
  0xa9   : > { %521 = dma.done.wait (%p416_p9), %s307_s27, 128  }
  0xaa   : > { %523 = vsyncadd (%p416_p9), %s307_s27, 4294967168  ;;  %s15_s14 = sadd.s32 1, %s546_s14   ;;  %s675_s9 = smov %s530_s10 }
  0xab   : > { %p12_p10 = scmp.ge.s32.totalorder %s15_s14, 4   ;;  %s676_s10 = smov %s534_s11 }
  0xac   : > { %s677_s11 = smov %s617_s22  ;;  %s678_s12 = smov %s542_s13 }
  0xad   : > { %s679_s13 = smov %s681_s17  ;;  %14 = sbr.rel (!%p12_p10) target bundleno = 4 (0x4), region = 70 }
  0xb2   :  { %313 = vsyncpa [#allocation3], 1 }
  0xb3   :  { %315 = vsyncpa [#allocation3 + $0x1], 1 }

</bundles_post_ra>
